<compile_context>
chip_gen: v5e
topology: v5e:2x2
jax: 0.10.0
libtpu: 0.0.40
codegen_flags: <defaults>
</compile_context>

<pallas_src>
import functools

import jax
import jax.numpy as jnp
from jax.experimental import pallas as pl
from jax.experimental.pallas import tpu as pltpu


def _round_up(a, b):
    return (a + b - 1) // b * b


def _vmem_plan():
    """Return (vmem_limit_bytes, per-pass double-buffered block budget) per chip generation."""
    try:
        cap = pltpu.get_tpu_info().vmem_capacity_bytes
    except Exception:
        cap = 64 << 20                      # assume the smallest generation (v7x: 64 MiB / TC)
    if cap >= (96 << 20):                   # v5e / v6e: 128 MiB physical VMEM
        return 64 << 20, 28 << 20
    return 40 << 20, 18 << 20               # v7x-class: stay well inside 64 MiB


def _choose_tile(hw, bytes_per_pixel, budget_bytes, fixed_bytes):
    """Largest 128-multiple pixel tile whose double-buffered blocks fit the budget."""
    avail = max(budget_bytes - fixed_bytes, 128 * bytes_per_pixel)
    t = (avail // max(bytes_per_pixel, 1)) // 128 * 128
    t = max(128, min(t, 32768))
    # TODO(synk): for tiny H*W with large batch, block several images per grid step instead.
    return min(t, _round_up(hw, 128))


# ---------------------------------------------------------------------------
# Pass 1: per-channel sum and sum-of-squares of (W @ x) for training-mode BN stats.
# grid = (split, N, tiles_per_split).  The leading "parallel" split axis yields
# partial sums (megacore-shardable on v7x); the trailing axes accumulate into
# resident (planes, 128) lane-wise partial blocks.
# ---------------------------------------------------------------------------
def _conv_stats_kernel(x_ref, w_ref, sum_ref, sq_ref, *, hw, tile, tiles_per_split):
    s = pl.program_id(0)
    n = pl.program_id(1)
    j = pl.program_id(2)

    @pl.when((n == 0) & (j == 0))
    def _init():
        sum_ref[...] = jnp.zeros_like(sum_ref)
        sq_ref[...] = jnp.zeros_like(sq_ref)

    start = (s * tiles_per_split + j) * tile          # global pixel offset of this block

    @pl.when(start < hw)                              # skip the overhanging megacore step
    def _accumulate():
        # (planes, C_in) @ (C_in, tile) -> (planes, tile); conv bias is folded out (cancels in BN).
        y = jnp.dot(w_ref[...], x_ref[...], preferred_element_type=jnp.float32)
        # Mask lanes past the end of the image: the tail block's OOB region holds garbage.
        lane = jax.lax.broadcasted_iota(jnp.int32, y.shape, 1)
        y = jnp.where(lane < (hw - start), y, 0.0)
        # Lane-wise partial sums (VPU adds); the final 128 -> 1 reduction happens on the host.
        planes = y.shape[0]
        yc = y.reshape(planes, tile // 128, 128)
        sum_ref[...] += jnp.sum(yc, axis=1)
        sq_ref[...] += jnp.sum(yc * yc, axis=1)


# ---------------------------------------------------------------------------
# Pass 2: recompute W'@x (BN scale pre-folded into W') and apply shift + ReLU.
# ---------------------------------------------------------------------------
def _conv_bn_relu_kernel(x_ref, w_ref, shift_ref, o_ref):
    y = jnp.dot(w_ref[...], x_ref[...], preferred_element_type=jnp.float32)
    o_ref[...] = jnp.maximum(y + shift_ref[...], 0.0).astype(o_ref.dtype)


def conv1x1_bn_relu(x_nchw, weight, bias, gamma, beta, eps=1e-5):
    """Conv2d(inplanes, planes, 1) -> BatchNorm2d (training-mode batch stats) -> ReLU.

    x_nchw: (N, C_in, H, W) f32.  weight: (planes, C_in).  bias/gamma/beta: (planes,).
    Returns (N, planes, H, W) f32.
    """
    N, C_in, H, W = x_nchw.shape
    planes = weight.shape[0]
    HW = H * W
    P = N * HW                                       # true pixel count for the statistics

    del bias  # cancels exactly inside training-mode BatchNorm (forward output only)

    vmem_limit, budget = _vmem_plan()
    w_bytes = 2 * planes * C_in * 4                  # double-buffered resident weight block
    stat_bytes = 4 * planes * 128 * 4                # the two (planes, 128) f32 accumulators

    # (N, C_in, H, W) -> (N, C_in, H*W) is free (no data movement); no padding, no slicing.
    x_flat = x_nchw.reshape(N, C_in, HW)

    # ---- pass 1: per-channel sum / sumsq of W@x (no y intermediate written) ----------
    tile1 = _choose_tile(HW, 2 * C_in * 4, budget, w_bytes + stat_bytes)
    n_tiles1 = pl.cdiv(HW, tile1)
    n_split = 2 if n_tiles1 >= 2 else 1              # always split when possible (v7x megacore)
    tps = pl.cdiv(n_tiles1, n_split)

    part_sum, part_sq = pl.pallas_call(
        functools.partial(_conv_stats_kernel, hw=HW, tile=tile1, tiles_per_split=tps),
        out_shape=(
            jax.ShapeDtypeStruct((n_split, planes, 128), jnp.float32),
            jax.ShapeDtypeStruct((n_split, planes, 128), jnp.float32),
        ),
        grid=(n_split, N, tps),
        in_specs=[
            pl.BlockSpec(
                (None, C_in, tile1),
                # Clamp the overhanging megacore step to the last real block; the kernel
                # skips its accumulation via pl.when, so the block content never matters.
                lambda s, n, j, _tps=tps, _last=n_tiles1 - 1:
                    (n, 0, jnp.minimum(s * _tps + j, _last)),
            ),
            pl.BlockSpec((planes, C_in), lambda s, n, j: (0, 0)),
        ],
        out_specs=(
            pl.BlockSpec((None, planes, 128), lambda s, n, j: (s, 0, 0)),
            pl.BlockSpec((None, planes, 128), lambda s, n, j: (s, 0, 0)),
        ),
        compiler_params=pltpu.CompilerParams(
            dimension_semantics=("parallel", "arbitrary", "arbitrary"),
            vmem_limit_bytes=vmem_limit),
    )(x_flat, weight)

    # ---- tiny per-channel glue: fold batch stats + affine into (W', shift) -----------
    ch_sum = jnp.sum(part_sum, axis=(0, 2)).reshape(planes, 1)
    ch_sq = jnp.sum(part_sq, axis=(0, 2)).reshape(planes, 1)
    mean_wx = ch_sum / P
    var = jnp.maximum(ch_sq / P - mean_wx * mean_wx, 0.0)    # biased batch variance, clamped
    inv_std = jax.lax.rsqrt(var + eps)
    scale = gamma.reshape(planes, 1) * inv_std
    w_fold = (scale * weight).astype(weight.dtype)           # BN scale folded into the weight
    shift = beta.reshape(planes, 1) - scale * mean_wx        # conv bias cancels exactly

    # ---- pass 2: recompute W'@x, add shift, ReLU, write NCHW directly ----------------
    tile2 = _choose_tile(HW, 2 * (C_in + planes) * 4, budget, w_bytes)
    n_tiles2 = pl.cdiv(HW, tile2)

    out_flat = pl.pallas_call(
        _conv_bn_relu_kernel,
        out_shape=jax.ShapeDtypeStruct((N, planes, HW), jnp.float32),
        grid=(N, n_tiles2),
        in_specs=[
            pl.BlockSpec((None, C_in, tile2), lambda n, j: (n, 0, j)),
            pl.BlockSpec((planes, C_in), lambda n, j: (0, 0)),
            pl.BlockSpec((planes, 1), lambda n, j: (0, 0)),
        ],
        out_specs=pl.BlockSpec((None, planes, tile2), lambda n, j: (n, 0, j)),
        compiler_params=pltpu.CompilerParams(
            dimension_semantics=("parallel", "parallel"),
            vmem_limit_bytes=vmem_limit),
    )(x_flat, w_fold, shift)

    return out_flat.reshape(N, planes, H, W)


def reference(x_nchw, weight, bias, gamma, beta, eps=1e-5):
    """Pure-JAX reference (PyTorch training-mode conv1x1 -> BN -> ReLU)."""
    N, C_in, H, W = x_nchw.shape
    planes = weight.shape[0]
    x_flat = jnp.transpose(x_nchw, (1, 0, 2, 3)).reshape(C_in, -1)
    y = weight @ x_flat + bias.reshape(planes, 1)
    mean = jnp.mean(y, axis=1, keepdims=True)
    var = jnp.mean((y - mean) ** 2, axis=1, keepdims=True)
    y = (y - mean) / jnp.sqrt(var + eps)
    y = y * gamma.reshape(planes, 1) + beta.reshape(planes, 1)
    y = jnp.maximum(y, 0.0)
    return jnp.transpose(y.reshape(planes, N, H, W), (1, 0, 2, 3))


if __name__ == "__main__":
    # Small deterministic setup: inplanes=4, planes=8, x: (2, 4, 16, 16)
    inplanes, planes = 4, 8
    N, H, W = 2, 16, 16

    key = jax.random.PRNGKey(0)
    kx, kw, kb, kg, kbeta = jax.random.split(key, 5)

    x = jax.random.normal(kx, (N, inplanes, H, W), dtype=jnp.float32)
    # nn.Conv2d(inplanes, planes, 1): weight (planes, inplanes, 1, 1) -> (planes, inplanes), bias (planes,)
    conv_w = jax.random.normal(kw, (planes, inplanes), dtype=jnp.float32) * 0.1
    conv_b = jax.random.normal(kb, (planes,), dtype=jnp.float32) * 0.1
    # BatchNorm affine params (perturbed from default init to exercise the fold)
    gamma = 1.0 + 0.1 * jax.random.normal(kg, (planes,), dtype=jnp.float32)
    beta = 0.1 * jax.random.normal(kbeta, (planes,), dtype=jnp.float32)

    out = conv1x1_bn_relu(x, conv_w, conv_b, gamma, beta)
    out = jax.block_until_ready(out)

    ref = reference(x, conv_w, conv_b, gamma, beta)
    assert out.shape == (N, planes, H, W)
    assert jnp.allclose(out, ref, atol=1e-4, rtol=1e-4), "mismatch vs reference"

    print("KERNEL_OK")
</pallas_src>

<mosaic_0001>
module attributes {stable_mosaic.version = 11 : i64} {
  func.func @_conv_stats_kernel(%arg0: i32, %arg1: i32, %arg2: i32, %arg3: memref<1x4x256xf32, #tpu.memory_space<vmem>>, %arg4: memref<8x4xf32, #tpu.memory_space<vmem>>, %arg5: memref<1x8x128xf32, #tpu.memory_space<vmem>>, %arg6: memref<1x8x128xf32, #tpu.memory_space<vmem>>) attributes {dimension_semantics = [#tpu.dimension_semantics<parallel>, #tpu.dimension_semantics<arbitrary>, #tpu.dimension_semantics<arbitrary>], iteration_bounds = array<i64: 1, 2, 1>, scalar_prefetch = 0 : i64, scratch_operands = 0 : i64, tpu.core_type = #tpu.core_type<tc>, window_params = [{transform_indices = @transform_0, window_bounds = array<i64: 1, 4, 256>}, {pipeline_mode = #tpu.pipeline_mode<synchronous>, transform_indices = @transform_1, window_bounds = array<i64: 8, 4>}, {transform_indices = @transform_2, window_bounds = array<i64: 1, 8, 128>}, {transform_indices = @transform_3, window_bounds = array<i64: 1, 8, 128>}]} {
    %c0_i32 = arith.constant 0 : i32
    %0 = arith.cmpi eq, %arg1, %c0_i32 : i32
    %c0_i32_0 = arith.constant 0 : i32
    %1 = arith.cmpi eq, %arg2, %c0_i32_0 : i32
    %2 = arith.andi %0, %1 : i1
    %3 = arith.extui %2 : i1 to i32
    %c0_i32_1 = arith.constant 0 : i32
    %4 = arith.cmpi ne, %3, %c0_i32_1 : i32
    scf.if %4 {
      %cst = arith.constant 0.000000e+00 : f32
      %11 = vector.broadcast %cst : f32 to vector<8x128xf32>
      %c0 = arith.constant 0 : index
      %c0_4 = arith.constant 0 : index
      %c0_5 = arith.constant 0 : index
      %12 = vector.load %arg5[%c0, %c0_4, %c0_5] : memref<1x8x128xf32, #tpu.memory_space<vmem>>, vector<1x8x128xf32>
      %13 = vector.shape_cast %12 : vector<1x8x128xf32> to vector<8x128xf32>
      %14 = vector.shape_cast %11 : vector<8x128xf32> to vector<1x8x128xf32>
      tpu.vector_store %arg5[%c0, %c0_4, %c0_5], %14 {strides = array<i32>} : memref<1x8x128xf32, #tpu.memory_space<vmem>>, vector<1x8x128xf32>,
      %cst_6 = arith.constant 0.000000e+00 : f32
      %15 = vector.broadcast %cst_6 : f32 to vector<8x128xf32>
      %c0_7 = arith.constant 0 : index
      %c0_8 = arith.constant 0 : index
      %c0_9 = arith.constant 0 : index
      %16 = vector.load %arg6[%c0_7, %c0_8, %c0_9] : memref<1x8x128xf32, #tpu.memory_space<vmem>>, vector<1x8x128xf32>
      %17 = vector.shape_cast %16 : vector<1x8x128xf32> to vector<8x128xf32>
      %18 = vector.shape_cast %15 : vector<8x128xf32> to vector<1x8x128xf32>
      tpu.vector_store %arg6[%c0_7, %c0_8, %c0_9], %18 {strides = array<i32>} : memref<1x8x128xf32, #tpu.memory_space<vmem>>, vector<1x8x128xf32>,
    } else {
    }
    %c1_i32 = arith.constant 1 : i32
    %5 = arith.muli %arg0, %c1_i32 : i32
    %6 = arith.addi %5, %arg2 : i32
    %c256_i32 = arith.constant 256 : i32
    %7 = arith.muli %6, %c256_i32 : i32
    %c256_i32_2 = arith.constant 256 : i32
    %8 = arith.cmpi slt, %7, %c256_i32_2 : i32
    %9 = arith.extui %8 : i1 to i32
    %c0_i32_3 = arith.constant 0 : i32
    %10 = arith.cmpi ne, %9, %c0_i32_3 : i32
    scf.if %10 {
      %c0 = arith.constant 0 : index
      %c0_4 = arith.constant 0 : index
      %11 = vector.load %arg4[%c0, %c0_4] : memref<8x4xf32, #tpu.memory_space<vmem>>, vector<8x4xf32>
      %c0_5 = arith.constant 0 : index
      %c0_6 = arith.constant 0 : index
      %c0_7 = arith.constant 0 : index
      %12 = vector.load %arg3[%c0_5, %c0_6, %c0_7] : memref<1x4x256xf32, #tpu.memory_space<vmem>>, vector<1x4x256xf32>
      %13 = vector.shape_cast %12 : vector<1x4x256xf32> to vector<4x256xf32>
      %cst = arith.constant dense<0.000000e+00> : vector<8x256xf32>
      %14 = tpu.matmul %11, %13, %cst {dimension_numbers = #tpu.dot_dimension_numbers<[1], [0], [0], [1], [0, 0, 1, 1], [], []>} : vector<8x4xf32>, vector<4x256xf32>, vector<8x256xf32> -> vector<8x256xf32>
      %15 = tpu.iota {dimensions = array<i32: 1>} : vector<8x256xi32>
      %c256_i32_8 = arith.constant 256 : i32
      %16 = arith.subi %c256_i32_8, %7 : i32
      %17 = vector.broadcast %16 : i32 to vector<8x256xi32>
      %18 = arith.cmpi slt, %15, %17 : vector<8x256xi32>
      %cst_9 = arith.constant 0.000000e+00 : f32
      %19 = vector.broadcast %cst_9 : f32 to vector<8x256xf32>
      %20 = arith.select %18, %14, %19 : vector<8x256xi1>, vector<8x256xf32>
      %21 = vector.shape_cast %20 : vector<8x256xf32> to vector<8x2x128xf32>
      %c0_10 = arith.constant 0 : index
      %c0_11 = arith.constant 0 : index
      %c0_12 = arith.constant 0 : index
      %22 = vector.load %arg5[%c0_10, %c0_11, %c0_12] : memref<1x8x128xf32, #tpu.memory_space<vmem>>, vector<1x8x128xf32>
      %23 = vector.shape_cast %22 : vector<1x8x128xf32> to vector<8x128xf32>
      %cst_13 = arith.constant dense<0.000000e+00> : vector<8x128xf32>
      %24 = vector.multi_reduction <add>, %21, %cst_13 [1] : vector<8x2x128xf32> to vector<8x128xf32>
      %25 = arith.addf %23, %24 : vector<8x128xf32>
      %c0_14 = arith.constant 0 : index
      %c0_15 = arith.constant 0 : index
      %c0_16 = arith.constant 0 : index
      %26 = vector.load %arg5[%c0_14, %c0_15, %c0_16] : memref<1x8x128xf32, #tpu.memory_space<vmem>>, vector<1x8x128xf32>
      %27 = vector.shape_cast %26 : vector<1x8x128xf32> to vector<8x128xf32>
      %28 = vector.shape_cast %25 : vector<8x128xf32> to vector<1x8x128xf32>
      tpu.vector_store %arg5[%c0_14, %c0_15, %c0_16], %28 {strides = array<i32>} : memref<1x8x128xf32, #tpu.memory_space<vmem>>, vector<1x8x128xf32>,
      %c0_17 = arith.constant 0 : index
      %c0_18 = arith.constant 0 : index
      %c0_19 = arith.constant 0 : index
      %29 = vector.load %arg6[%c0_17, %c0_18, %c0_19] : memref<1x8x128xf32, #tpu.memory_space<vmem>>, vector<1x8x128xf32>
      %30 = vector.shape_cast %29 : vector<1x8x128xf32> to vector<8x128xf32>
      %31 = arith.mulf %21, %21 : vector<8x2x128xf32>
      %cst_20 = arith.constant dense<0.000000e+00> : vector<8x128xf32>
      %32 = vector.multi_reduction <add>, %31, %cst_20 [1] : vector<8x2x128xf32> to vector<8x128xf32>
      %33 = arith.addf %30, %32 : vector<8x128xf32>
      %c0_21 = arith.constant 0 : index
      %c0_22 = arith.constant 0 : index
      %c0_23 = arith.constant 0 : index
      %34 = vector.load %arg6[%c0_21, %c0_22, %c0_23] : memref<1x8x128xf32, #tpu.memory_space<vmem>>, vector<1x8x128xf32>
      %35 = vector.shape_cast %34 : vector<1x8x128xf32> to vector<8x128xf32>
      %36 = vector.shape_cast %33 : vector<8x128xf32> to vector<1x8x128xf32>
      tpu.vector_store %arg6[%c0_21, %c0_22, %c0_23], %36 {strides = array<i32>} : memref<1x8x128xf32, #tpu.memory_space<vmem>>, vector<1x8x128xf32>,
    } else {
    }
    return
  }
  func.func @transform_0(%arg0: i32, %arg1: i32, %arg2: i32) -> (i32, i32, i32) {
    %c1_i32 = arith.constant 1 : i32
    %0 = arith.muli %arg0, %c1_i32 : i32
    %1 = arith.addi %0, %arg2 : i32
    %c0_i32 = arith.constant 0 : i32
    %2 = arith.minsi %1, %c0_i32 : i32
    %c0_i32_0 = arith.constant 0 : i32
    %c0_i32_1 = arith.constant 0 : i32
    return %arg1, %c0_i32_0, %2 : i32, i32, i32
  }
  func.func @transform_1(%arg0: i32, %arg1: i32, %arg2: i32) -> (i32, i32) {
    %c0_i32 = arith.constant 0 : i32
    %c0_i32_0 = arith.constant 0 : i32
    %c0_i32_1 = arith.constant 0 : i32
    return %c0_i32, %c0_i32_0 : i32, i32
  }
  func.func @transform_2(%arg0: i32, %arg1: i32, %arg2: i32) -> (i32, i32, i32) {
    %c0_i32 = arith.constant 0 : i32
    %c0_i32_0 = arith.constant 0 : i32
    %c0_i32_1 = arith.constant 0 : i32
    return %arg0, %c0_i32, %c0_i32_0 : i32, i32, i32
  }
  func.func @transform_3(%arg0: i32, %arg1: i32, %arg2: i32) -> (i32, i32, i32) {
    %c0_i32 = arith.constant 0 : i32
    %c0_i32_0 = arith.constant 0 : i32
    %c0_i32_1 = arith.constant 0 : i32
    return %arg0, %c0_i32, %c0_i32_0 : i32, i32, i32
  }
}

</mosaic_0001>

<bundles_post_ra>
// kernel: tpu_custom_call.1
= control target key start
LH: loop header
LB: loop body
LE: loop exit
PB: predicated region body
PF: predicated region fallthrough
CT: control target
= control target key end

     0   :  { %9 = vsyncpa [#allocation3], 0  ;;  %s1042_s0 = inlined_call_operand.hbm [shape: f32[2,4,256], index: 0, kind: input, shape index: {}]   ;;  %s1043_s1 = inlined_call_operand.vmem [shape: f32[8,4], index: 1, kind: input, shape index: {}]   ;;  %s1044_s2 = inlined_call_operand.hbm [shape: f32[1,8,128], index: 2, kind: output, shape index: {0}]   ;;  %s1045_s3 = inlined_call_operand.hbm [shape: f32[1,8,128], index: 3, kind: output, shape index: {1}]  }
   0x1   :  { %11 = vsyncpa [#allocation3 + $0x1], 0 }
   0x2   :  { %12 = vsyncpa [#allocation4], 0 }
   0x3   :  { %13 = vsyncpa [#allocation7], 0  ;;  %s889_s12 = smov 0   ;;  %s891_s13 = smov 0  }
   0x4   :  { %s893_s14 = smov 0   ;;  %s895_s15 = smov 0  }
   0x5   :  { %s897_s16 = smov 0   ;;  %s899_s17 = smov 0  }
   0x6 LB: > { %s625_s18 = sadd.s32 4294967295, %s862_s17   ;;  %s34_s19 = sadd.s32 1, %s858_s16  ;;  %s862_s17 = sphi %s899_s17, %s19_s17   ;;  %s858_s16 = sphi %s897_s16, %s1053_s16   ;;  %s854_s15 = sphi %s895_s15, %s1052_s15   ;;  %s850_s14 = sphi %s893_s14, %s1051_s14   ;;  %s846_s13 = sphi %s891_s13, %s1050_s13   ;;  %s842_s12 = sphi %s889_s12, %s1049_s12  }
   0x7   : > { %p36_p0 = scmp.ge.s32.totalorder %s34_s19, 2  ;;  %s53_s20 = sadd.s32 1, %s850_s14 }
   0x8   : > { %p60_p1 = scmp.ne.s32.totalorder %s850_s14, %s846_s13  ;;  %p61_p2 = scmp.eq.s32.totalorder %s862_s17, 0 }
   0x9   : > { %s1055_s19 = smov (%p36_p0, %s34_s19), 0  ;;  %p66_p4 = scmp.ne.s32.totalorder %s846_s13, %s842_s12 }
   0xa   : > { %p925_p3 = por %p61_p2, %p60_p1  ;;  %s48_s22 = ssub.s32 %s858_s16, %s1055_s19 }
   0xb   : > { %p67_p5 = scmp.eq.s32.totalorder %s625_s18, 0  ;;  %p51_p6 = scmp.eq.s32.totalorder %s48_s22, 0 }
   0xc   : > { %p660_p8 = scmp.lt.s32.totalorder %s862_s17, 2  ;;  %s166_s25 = sand.u32 1, %s850_s14  }
   0xd   : > { %p934_p7 = por %p67_p5, %p66_p4  ;;  %s644_s26 = sshll.u32 %s858_s16, 3 }
   0xe   : > { %s940_s24 = scalar_select %p51_p6, %s850_s14, %s53_s20  }
   0xf   : > { %s628_s27 = sshll.u32 %s166_s25, 3  ;;  %s180_s30 = scalar_lea.hbm %s1042_s0, %s644_s26 }
  0x10   : > { %s182_s4 = sshll.u32 %s180_s30, 4  ;;  %s170_s5 = scalar_lea.vmem [#allocation2], %s628_s27  ;;  %s183_s4 = int_to_ptr.hbm [resolvable:$true] %s182_s4 }
  0x11   : > { %s184_s6 = sshll.u32 %s170_s5, 4  ;;  %p657_p9 = pnand %p660_p8, %p925_p3  ;;  %s185_s6 = int_to_ptr.vmem [resolvable:$true] %s184_s6 }
  0x12   : > { %p631_p10 = scmp.ge.s32.totalorder %s862_s17, 1  ;;  %p189_p11 = scmp.lt.s32.totalorder %s862_s17, 3 }
  0x13   : > { %s167_s7 = scalar_lea.sflag [#allocation3], %s166_s25 }
  0x14   : > { %659 = dma.hbm_to_vmem [thread:$0]  (!%p657_p9), %s183_s4, 128, %s185_s6, %s167_s7  }
  0x15   : > { %p190_p12 = pnand %p631_p10, %p189_p11 }
  0x16   : > { %s195_s8 = sand.u32 (!%p190_p12), 1, %s846_s13  }
  0x17   : > { %193 = sbr.rel (%p190_p12) target bundleno = 231 (0xe7), region = 28  ;;  %s632_s9 = sshll.u32 (!%p190_p12), %s195_s8, 3 }
  0x18   : > { %s196_s10 = scalar_lea.sflag (!%p190_p12), [#allocation3], %s195_s8  ;;  %s199_s11 = scalar_lea.vmem (!%p190_p12), [#allocation2], %s632_s9 }
  0x1c   : > { %829 = dma.done.wait (%p934_p7), %s196_s10, 128  }
  0x1d   : > { %831 = vsyncadd (%p934_p7), %s196_s10, 4294967168  ;;  %p222_p13 = scmp.eq.s32.totalorder %s854_s15, 0 }
  0x1e   : > { %v864_v0 = vmov (%p222_p13), 0.0  }
  0x1f   : > { %227 = sbr.rel (!%p222_p13) target bundleno = 36 (0x24), region = 36  ;;  %228 = vst [vmem:[#allocation5] sm:$0xff] (%p222_p13), %v864_v0 }
  0x20   : > { %229 = vst [vmem:[#allocation6] sm:$0xff] (%p222_p13), %v864_v0 }
  0x24 PF: > { %v237_v1 = vld [vmem:[%s199_s11] sm:$0xff]  ;;  %vm246_vm0 = vcmask 1043456   ;;  %v236_v2 = vld [vmem:[%s1043_s1] sm:$0xff]  ;;  %vm242_vm1 = vcmask 31744   ;;  %v865_v5 = vmov 1983009808  }
  0x25   : > { %239 = vst [vmem:[#allocation1] ss:$2 sm:$0xff] %v237_v1  ;;  %v304_v6 = vunpack.c.l.s4 %v865_v5  ;;  %v866_v8 = vmov 1934713408   ;;  %vm301_vm2 = vcmask 1047556   ;;  %vm354_vm3 = vcmask 1041408  }
  0x26   : > { %v326_v9 = vunpack.c.l.s4 %v866_v8  ;;  %vm419_vm4 = vcmask 1041409   ;;  %vm421_vm5 = vcmask 1042434   ;;  %vm423_vm6 = vcmask 1043459   ;;  %s867_s15 = smov [#allocation5]   ;;  %s529_s25 = sshll.u32 %s1044_s2, 4  ;;  %s530_s25 = int_to_ptr.hbm [resolvable:$true] %s529_s25 }
  0x27   : > { %v305_v7 = vunpack.c.0.s8 %v304_v6  ;;  %vm425_vm7 = vcmask 1044484   ;;  %vm427_vm8 = vcmask 1045509   ;;  %vm429_vm9 = vcmask 1046534   ;;  %s527_s21 = sshll.u32 %s867_s15, 4  ;;  %p1000_p0 = scmp.eq.s32.totalorder %s625_s18, 1  ;;  %s528_s21 = int_to_ptr.vmem [resolvable:$true] %s527_s21 }
  0x28   : > { %v327_v16 = vunpack.c.0.s8 %v326_v9  ;;  %vm431_vm10 = vcmask 1047559   ;;  %s868_s18 = smov [#allocation6]   ;;  %s543_s30 = sshll.u32 %s1045_s3, 4  ;;  %s544_s30 = int_to_ptr.hbm [resolvable:$true] %s543_s30 }
  0x29   : > { %s541_s27 = sshll.u32 %s868_s18, 4  ;;  %s542_s27 = int_to_ptr.vmem [resolvable:$true] %s541_s27 }
  0x2c   : > { %v240_v3 = vld.sshfl [vmem:[#allocation1] sm:$0xff pattern:$0x75316420]  ;;  %v241_v4 = vld.sshfl [vmem:[#allocation1 + $0x8] sm:$0xff pattern:$0x75316420] }
  0x2d   : > { %634 = vmatpush.msk.msra.mxu0 %vm246_vm0, %v240_v3  ;;  %636 = vmatpush.msk.msra.mxu1 %vm246_vm0, %v241_v4 }
  0x2e   : > { %635 = vmatmul.msk.f32.vlgmr.msra.gmra.mxu0 %vm242_vm1, %v236_v2  ;;  %637 = vmatmul.msk.f32.vlgmr.msra.gmra.mxu1 %vm242_vm1, %v236_v2 }
  0xab   : > { %v268_v10 = vpop.f32.mrf.mxu0  ;;  %v288_v11 = vpop.f32.mrf.mxu1 }
  0xac   : > { %v300_v12 = vrot.slane %v268_v10, 4  ;;  %v306_v13 = vperm.slane %v268_v10, %v305_v7  ;;  %v311_v14 = vrot.slane %v288_v11, 4  ;;  %v316_v15 = vperm.slane %v288_v11, %v305_v7 }
  0xae   : > { %v302_v17 = vsel %vm301_vm2, 0.0, %v300_v12  ;;  %v323_v18 = vrot.slane %v306_v13, 4  ;;  %v312_v19 = vsel %vm301_vm2, 0.0, %v311_v14  ;;  %v321_v20 = vrot.slane %v316_v15, 4 }
  0xaf   : > { %v310_v21 = vperm.slane %v302_v17, %v305_v7  ;;  %v320_v22 = vperm.slane %v312_v19, %v305_v7 }
  0xb0   : > { %v322_v23 = vsel %vm301_vm2, %v321_v20, %v306_v13  ;;  %v324_v24 = vsel %vm301_vm2, %v316_v15, %v323_v18 }
  0xb1   : > { %v335_v25 = vrot.slane %v310_v21, 4  ;;  %v328_v26 = vperm.slane %v322_v23, %v327_v16  ;;  %v332_v27 = vperm.slane %v324_v24, %v327_v16  ;;  %v333_v28 = vrot.slane %v320_v22, 4 }
  0xb3   : > { %v334_v29 = vsel %vm301_vm2, %v333_v28, %v310_v21  ;;  %v336_v30 = vsel %vm301_vm2, %v320_v22, %v335_v25  ;;  %v345_v31 = vrot.slane %v328_v26, 4  ;;  %v347_v32 = vrot.slane %v332_v27, 4 }
  0xb4   : > { %v340_v33 = vperm.slane %v334_v29, %v327_v16  ;;  %v344_v34 = vperm.slane %v336_v30, %v327_v16  ;;  %v355_v35 = vsel %vm354_vm3, %v328_v26, 0.0  ;;  %v369_v36 = vsel %vm354_vm3, %v332_v27, 0.0 }
  0xb5   : > { %v346_v37 = vsel %vm301_vm2, 0.0, %v345_v31  ;;  %v348_v38 = vsel %vm301_vm2, 0.0, %v347_v32  ;;  %v356_v39 = vrot.slane %v355_v35, 4  ;;  %v370_v40 = vrot.slane %v369_v36, 4 }
  0xb6   : > { %v349_v41 = vrot.slane %v340_v33, 4  ;;  %v362_v42 = vsel %vm354_vm3, %v346_v37, 0.0  ;;  %v376_v43 = vsel %vm354_vm3, %v348_v38, 0.0  ;;  %v383_v49 = vsel %vm354_vm3, %v340_v33, 0.0 }
  0xb7   : > { %v357_v44 = vadd.f32 %v356_v39, %v355_v35  ;;  %v363_v45 = vrot.slane %v362_v42, 4  ;;  %v371_v46 = vadd.f32 %v370_v40, %v369_v36  ;;  %v377_v47 = vrot.slane %v376_v43, 4 }
  0xb8   : > { %v350_v48 = vsel %vm301_vm2, 0.0, %v349_v41  ;;  %v397_v50 = vsel %vm354_vm3, %v344_v34, 0.0  ;;  %v351_v55 = vrot.slane %v344_v34, 4  ;;  %v384_v56 = vrot.slane %v383_v49, 4 }
  0xb9   : > { %v358_v51 = vrot.slane %v357_v44, 2  ;;  %v364_v52 = vadd.f32 %v363_v45, %v362_v42  ;;  %v372_v53 = vrot.slane %v371_v46, 2  ;;  %v378_v54 = vadd.f32 %v377_v47, %v376_v43 }
  0xba   : > { %v398_v57 = vrot.slane %v397_v50, 4  ;;  %v385_v62 = vadd.f32 %v384_v56, %v383_v49  ;;  %v390_v63 = vsel %vm354_vm3, %v350_v48, 0.0  ;;  %v437_v1 = vmul.f32 %v328_v26, %v328_v26 }
  0xbb   : > { %v359_v58 = vadd.f32 %v358_v51, %v357_v44  ;;  %v365_v59 = vrot.slane %v364_v52, 2  ;;  %v373_v60 = vadd.f32 %v372_v53, %v371_v46  ;;  %v379_v61 = vrot.slane %v378_v54, 2 }
  0xbc   : > { %v399_v0 = vadd.f32 %v398_v57, %v397_v50  ;;  %v386_v6 = vrot.slane %v385_v62, 2  ;;  %v438_v7 = vmul.f32 %v346_v37, %v346_v37  ;;  %v439_v8 = vmul.f32 %v332_v27, %v332_v27 }
  0xbd   : > { %v360_v2 = vrot.slane %v359_v58, 1  ;;  %v366_v3 = vadd.f32 %v365_v59, %v364_v52  ;;  %v374_v4 = vrot.slane %v373_v60, 1  ;;  %v380_v5 = vadd.f32 %v379_v61, %v378_v54 }
  0xbe   : > { %v440_v9 = vmul.f32 %v348_v38, %v348_v38  ;;  %v352_v10 = vsel %vm301_vm2, 0.0, %v351_v55  ;;  %v391_v11 = vrot.slane %v390_v63, 4  ;;  %v400_v12 = vrot.slane %v399_v0, 2 }
  0xbf   : > { %v361_v13 = vadd.f32 %v360_v2, %v359_v58  ;;  %v367_v14 = vrot.slane %v366_v3, 1  ;;  %v441_v15 = vmul.f32 %v340_v33, %v340_v33  ;;  %v443_v16 = vmul.f32 %v344_v34, %v344_v34 }
  0xc0   : > { %v375_v17 = vadd.f32 %v374_v4, %v373_v60  ;;  %v381_v18 = vrot.slane %v380_v5, 1  ;;  %v387_v19 = vadd.f32 %v386_v6, %v385_v62  ;;  %v445_v20 = vsel %vm354_vm3, %v437_v1, 0.0 }
  0xc1   : > { %v446_v21 = vrot.slane %v445_v20, 4  ;;  %v452_v22 = vsel %vm354_vm3, %v438_v7, 0.0  ;;  %v459_v23 = vsel %vm354_vm3, %v439_v8, 0.0  ;;  %v466_v24 = vsel %vm354_vm3, %v440_v9, 0.0 }
  0xc2   : > { %v453_v25 = vrot.slane %v452_v22, 4  ;;  %v460_v26 = vrot.slane %v459_v23, 4  ;;  %v467_v27 = vrot.slane %v466_v24, 4  ;;  %v473_v28 = vsel %vm354_vm3, %v441_v15, 0.0 }
  0xc3   : > { %v442_v29 = vmul.f32 %v350_v48, %v350_v48  ;;  %v447_v30 = vadd.f32 %v446_v21, %v445_v20  ;;  %v474_v31 = vrot.slane %v473_v28, 4  ;;  %v487_v32 = vsel %vm354_vm3, %v443_v16, 0.0 }
  0xc4   : > { %v368_v33 = vadd.f32 %v367_v14, %v366_v3  ;;  %v454_v34 = vadd.f32 %v453_v25, %v452_v22  ;;  %v461_v35 = vadd.f32 %v460_v26, %v459_v23  ;;  %v468_v36 = vadd.f32 %v467_v27, %v466_v24  ;;  %v353_v23 = vld [vmem:[#allocation5] sm:$0xff] }
  0xc5   : > { %v382_v37 = vadd.f32 %v381_v18, %v380_v5  ;;  %v448_v38 = vrot.slane %v447_v30, 2  ;;  %v388_v39 = vrot.slane %v387_v19, 1  ;;  %v392_v40 = vadd.f32 %v391_v11, %v390_v63 }
  0xc6   : > { %v455_v41 = vrot.slane %v454_v34, 2  ;;  %v462_v42 = vrot.slane %v461_v35, 2  ;;  %v475_v43 = vadd.f32 %v474_v31, %v473_v28  ;;  %v488_v44 = vrot.slane %v487_v32, 4 }
  0xc7   : > { %v449_v45 = vadd.f32 %v448_v38, %v447_v30  ;;  %v469_v46 = vrot.slane %v468_v36, 2  ;;  %v393_v47 = vrot.slane %v392_v40, 2  ;;  %v401_v48 = vadd.f32 %v400_v12, %v399_v0 }
  0xc8   : > { %v444_v49 = vmul.f32 %v352_v10, %v352_v10  ;;  %v456_v50 = vadd.f32 %v455_v41, %v454_v34  ;;  %v463_v51 = vadd.f32 %v462_v42, %v461_v35  ;;  %v404_v52 = vsel %vm354_vm3, %v352_v10, 0.0 }
  0xc9   : > { %v450_v53 = vrot.slane %v449_v45, 1  ;;  %v389_v54 = vadd.f32 %v388_v39, %v387_v19  ;;  %v394_v55 = vadd.f32 %v393_v47, %v392_v40  ;;  %v405_v56 = vrot.slane %v404_v52, 4 }
  0xca   : > { %v457_v57 = vrot.slane %v456_v50, 1  ;;  %v489_v58 = vadd.f32 %v488_v44, %v487_v32  ;;  %v402_v59 = vrot.slane %v401_v48, 1  ;;  %v420_v60 = vsel %vm419_vm4, %v368_v33, %v361_v13 }
  0xcb   : > { %v470_v61 = vadd.f32 %v469_v46, %v468_v36  ;;  %v476_v62 = vrot.slane %v475_v43, 2  ;;  %v395_v63 = vrot.slane %v394_v55, 1  ;;  %v406_v1 = vadd.f32 %v405_v56, %v404_v52 }
  0xcc   : > { %v451_v2 = vadd.f32 %v450_v53, %v449_v45  ;;  %v464_v0 = vrot.slane %v463_v51, 1  ;;  %v422_v5 = vsel %vm421_vm5, %v375_v17, %v420_v60  ;;  %v458_v6 = vadd.f32 %v457_v57, %v456_v50  ;;  %v436_v45 = vld [vmem:[#allocation6] sm:$0xff] }
  0xcd   : > { %v396_v3 = vadd.f32 %v395_v63, %v394_v55  ;;  %v407_v4 = vrot.slane %v406_v1, 2  ;;  %v403_v7 = vadd.f32 %v402_v59, %v401_v48  ;;  %v424_v8 = vsel %vm423_vm6, %v382_v37, %v422_v5 }
  0xce   : > { %v426_v10 = vsel %vm425_vm7, %v389_v54, %v424_v8  ;;  %v477_v11 = vadd.f32 %v476_v62, %v475_v43  ;;  %v480_v13 = vsel %vm354_vm3, %v442_v29, 0.0  ;;  %v490_v14 = vrot.slane %v489_v58, 2 }
  0xcf   : > { %v408_v9 = vadd.f32 %v407_v4, %v406_v1  ;;  %v428_v12 = vsel %vm427_vm8, %v396_v3, %v426_v10  ;;  %v494_v15 = vsel %vm354_vm3, %v444_v49, 0.0  ;;  %v465_v16 = vadd.f32 %v464_v0, %v463_v51 }
  0xd0   : > { %v471_v17 = vrot.slane %v470_v61, 1  ;;  %v481_v19 = vrot.slane %v480_v13, 4  ;;  %v430_v20 = vsel %vm429_vm9, %v403_v7, %v428_v12  ;;  %v495_v21 = vrot.slane %v494_v15, 4 }
  0xd1   : > { %v409_v18 = vrot.slane %v408_v9, 1  ;;  %v509_v22 = vsel %vm419_vm4, %v458_v6, %v451_v2  ;;  %v478_v26 = vrot.slane %v477_v11, 1  ;;  %v491_v27 = vadd.f32 %v490_v14, %v489_v58 }
  0xd2   : > { %v482_v25 = vadd.f32 %v481_v19, %v480_v13  ;;  %v496_v28 = vadd.f32 %v495_v21, %v494_v15  ;;  %v510_v29 = vsel %vm421_vm5, %v465_v16, %v509_v22  ;;  %v472_v31 = vadd.f32 %v471_v17, %v470_v61 }
  0xd3   : > { %v410_v24 = vadd.f32 %v409_v18, %v408_v9  ;;  %v479_v37 = vadd.f32 %v478_v26, %v477_v11  ;;  %v492_v38 = vrot.slane %v491_v27, 1 }
  0xd4   : > { %v483_v32 = vrot.slane %v482_v25, 2  ;;  %v497_v34 = vrot.slane %v496_v28, 2  ;;  %v511_v36 = vsel %vm423_vm6, %v472_v31, %v510_v29 }
  0xd5   : > { %v432_v30 = vsel %vm431_vm10, %v410_v24, %v430_v20  ;;  %v512_v42 = vsel %vm425_vm7, %v479_v37, %v511_v36  ;;  %v493_v44 = vadd.f32 %v492_v38, %v491_v27 }
  0xd6   : > { %v434_v33 = vadd.f32 %v432_v30, %v353_v23  ;;  %v484_v35 = vadd.f32 %v483_v32, %v482_v25  ;;  %v498_v39 = vadd.f32 %v497_v34, %v496_v28 }
  0xd8   : > { %435 = vst [vmem:[#allocation5] sm:$0xff] %v434_v33  ;;  %v485_v40 = vrot.slane %v484_v35, 1  ;;  %v499_v41 = vrot.slane %v498_v39, 1 }
  0xd9   : > { %649 = dma.vmem_to_hbm [thread:$0]  (%p1000_p0), %s528_s21, 128, %s530_s25, [#allocation4]  }
  0xda   : > { %v486_v43 = vadd.f32 %v485_v40, %v484_v35  ;;  %v500_v46 = vadd.f32 %v499_v41, %v498_v39 }
  0xdc   : > { %v513_v47 = vsel %vm427_vm8, %v486_v43, %v512_v42 }
  0xdd   : > { %v514_v48 = vsel %vm429_vm9, %v493_v44, %v513_v47 }
  0xde   : > { %v515_v49 = vsel %vm431_vm10, %v500_v46, %v514_v48 }
  0xdf   : > { %v517_v50 = vadd.f32 %v515_v49, %v436_v45 }
  0xe1   : > { %518 = vst [vmem:[#allocation6] sm:$0xff] %v517_v50 }
  0xe2   : > { %651 = dma.vmem_to_hbm [thread:$0]  (%p1000_p0), %s542_s27, 128, %s544_s30, [#allocation7]  }
  0xe3   : > { %833 = dma.done.wait (%p1000_p0), [#allocation4], 128  }
  0xe4   : > { %835 = vsyncadd (%p1000_p0), [#allocation4], 4294967168 }
  0xe5   : > { %837 = dma.done.wait (%p1000_p0), [#allocation7], 128  }
  0xe6   : > { %839 = vsyncadd (%p1000_p0), [#allocation7], 4294967168 }
  0xe7 PF: > { %s19_s17 = sadd.s32 1, %s862_s17   ;;  %s1049_s12 = smov %s846_s13 }
  0xe8   : > { %p16_p1 = scmp.ge.s32.totalorder %s19_s17, 4   ;;  %s1050_s13 = smov %s850_s14 }
  0xe9   : > { %s1051_s14 = smov %s940_s24  ;;  %s1052_s15 = smov %s858_s16 }
  0xea   : > { %s1053_s16 = smov %s1055_s19  ;;  %18 = sbr.rel (!%p16_p1) target bundleno = 6 (0x6), region = 83 }
  0xef   :  { %562 = vsyncpa [#allocation3], 1 }
  0xf0   :  { %564 = vsyncpa [#allocation3 + $0x1], 1 }
  0xf1   :  { %565 = vsyncpa [#allocation4], 1 }
  0xf2   :  { %567 = vsyncpa [#allocation4 + $0x1], 1 }
  0xf3   :  { %568 = vsyncpa [#allocation7], 1 }

</bundles_post_ra>
